<compile_context>
chip_gen: v7x
topology: tpu7x:2x2x1
jax: 0.10.0
libtpu: 0.0.40
codegen_flags: <defaults>
</compile_context>

<pallas_src>
import functools

import jax
import jax.numpy as jnp
from jax import lax
from jax.experimental import pallas as pl
from jax.experimental.pallas import tpu as pltpu


def _round_up(x, m):
    return ((x + m - 1) // m) * m


# ---------------------------------------------------------------------------
# Kernel: one grid step == TS MTRNN time steps.  State is VMEM-resident.
# ---------------------------------------------------------------------------
def _mtrnn_time_block_kernel(
    # inputs
    xp_ref,      # (TS, B, C)  pre-projected input block (x @ w_x), f32
    h0_ref,      # (B, C)      initial [h_fast | h_slow | 0]
    u0_ref,      # (B, C)      initial [u_fast | u_slow | 0]
    alpha_ref,   # (B, C)      per-lane (1 - 1/tau), pre-broadcast
    beta_ref,    # (B, C)      per-lane (1/tau),     pre-broadcast
    w_h_ref,     # (C, C)      fused recurrent block matrix (f32 or bf16)
    # outputs
    h_seq_ref,   # (TS, B, C)  per-step new_h (lane-dense)
    h_fin_ref,   # (B, C)      final h (aliased with h0)
    u_fin_ref,   # (B, C)      final u (aliased with u0)
    # scratch (persists across grid steps)
    h_scr,       # (B, C) f32
    u_scr,       # (B, C) f32
    *, ts, t_total,
):
    blk = pl.program_id(0)

    @pl.when(blk == 0)
    def _():
        h_scr[...] = h0_ref[...]
        u_scr[...] = u0_ref[...]
        h_fin_ref[...] = h0_ref[...]
        u_fin_ref[...] = u0_ref[...]

    wd = w_h_ref.dtype                    # MXU operand dtype (f32 or bf16)
    w_h = w_h_ref[...]
    alpha = alpha_ref[...]
    beta = beta_ref[...]
    base = blk * ts

    def step(i, carry):
        h, u = carry                      # f32 register carry
        # Single recurrent MXU push per step; f32 accumulation.
        cell_in = xp_ref[i] + jnp.dot(h.astype(wd), w_h,
                                      preferred_element_type=jnp.float32)
        new_u = alpha * u + beta * cell_in
        new_h = jnp.tanh(new_u)
        h_seq_ref[i] = new_h              # unmasked lane-dense (B, C) store

        # Capture the true final state exactly at global step T-1 (padded tail
        # steps beyond T-1 never touch the final-state outputs).
        @pl.when(base + i == t_total - 1)
        def _():
            h_fin_ref[...] = new_h
            u_fin_ref[...] = new_u

        return new_h, new_u

    h, u = lax.fori_loop(0, ts, step, (h_scr[...], u_scr[...]), unroll=True)
    h_scr[...] = h
    u_scr[...] = u


# ---------------------------------------------------------------------------
# Jitted wrapper: projection + fused recurrence kernel + output head.
# ---------------------------------------------------------------------------
@functools.partial(jax.jit, static_argnames=("fast_tau", "slow_tau"))
def _mtrnn_sequence_impl(x_seq, h_fast, h_slow, u_fast, u_slow,
                         w_x, w_h, w_out, b_out, *, fast_tau, slow_tau):
    T, B, _ = x_seq.shape
    assert T >= 1
    fast_dim = h_fast.shape[-1]
    slow_dim = h_slow.shape[-1]
    ctx = fast_dim + slow_dim
    ctx_pad = w_h.shape[0]
    wd = w_h.dtype

    # (1) Input projection hoisted out of the recurrence: one batched matmul.
    x_proj = jnp.einsum("tbi,ic->tbc", x_seq.astype(w_x.dtype), w_x,
                        preferred_element_type=jnp.float32)

    # (3) Time blocking: TS steps per grid iteration, unrolled in-kernel.
    ts = T if T <= 32 else 32
    nb = pl.cdiv(T, ts)
    t_pad = nb * ts
    if t_pad != T:
        x_proj = jnp.pad(x_proj, ((0, t_pad - T), (0, 0), (0, 0)))

    pad_c = ctx_pad - ctx
    zpad = jnp.zeros((B, pad_c), jnp.float32)
    h0 = jnp.concatenate([h_fast, h_slow, zpad], axis=-1).astype(jnp.float32)
    u0 = jnp.concatenate([u_fast, u_slow, zpad], axis=-1).astype(jnp.float32)

    # (4) Pre-broadcast per-lane time constants to (B, ctx_pad).
    alpha_lane = jnp.concatenate([
        jnp.full((fast_dim,), 1.0 - 1.0 / fast_tau, jnp.float32),
        jnp.full((slow_dim,), 1.0 - 1.0 / slow_tau, jnp.float32),
        jnp.zeros((pad_c,), jnp.float32)], axis=0)
    beta_lane = jnp.concatenate([
        jnp.full((fast_dim,), 1.0 / fast_tau, jnp.float32),
        jnp.full((slow_dim,), 1.0 / slow_tau, jnp.float32),
        jnp.zeros((pad_c,), jnp.float32)], axis=0)
    alpha = jnp.broadcast_to(alpha_lane[None, :], (B, ctx_pad))
    beta = jnp.broadcast_to(beta_lane[None, :], (B, ctx_pad))

    kernel = functools.partial(_mtrnn_time_block_kernel, ts=ts, t_total=T)

    h_seq, h_fin, u_fin = pl.pallas_call(
        kernel,
        out_shape=(
            jax.ShapeDtypeStruct((t_pad, B, ctx_pad), jnp.float32),
            jax.ShapeDtypeStruct((B, ctx_pad), jnp.float32),
            jax.ShapeDtypeStruct((B, ctx_pad), jnp.float32),
        ),
        grid=(nb,),
        in_specs=[
            pl.BlockSpec((ts, B, ctx_pad), lambda b: (b, 0, 0)),  # x_proj block
            pl.BlockSpec((B, ctx_pad), lambda b: (0, 0)),         # h0 (resident)
            pl.BlockSpec((B, ctx_pad), lambda b: (0, 0)),         # u0 (resident)
            pl.BlockSpec((B, ctx_pad), lambda b: (0, 0)),         # alpha
            pl.BlockSpec((B, ctx_pad), lambda b: (0, 0)),         # beta
            pl.BlockSpec((ctx_pad, ctx_pad), lambda b: (0, 0)),   # w_h (resident)
        ],
        out_specs=(
            pl.BlockSpec((ts, B, ctx_pad), lambda b: (b, 0, 0)),  # per-step h
            pl.BlockSpec((B, ctx_pad), lambda b: (0, 0)),         # final h
            pl.BlockSpec((B, ctx_pad), lambda b: (0, 0)),         # final u
        ),
        scratch_shapes=[
            pltpu.VMEM((B, ctx_pad), jnp.float32),   # h carry
            pltpu.VMEM((B, ctx_pad), jnp.float32),   # u carry
        ],
        input_output_aliases={1: 1, 2: 2},           # state in -> state out
        compiler_params=pltpu.CompilerParams(
            dimension_semantics=("arbitrary",),      # time is sequential
        ),
    )(x_proj, h0, u0, alpha, beta, w_h)

    # (2) Output head hoisted: one batched matmul + tanh over the whole seq.
    h_fast_seq = h_seq[:T, :, :fast_dim]
    y = jnp.tanh(
        jnp.einsum("tbf,fo->tbo", h_fast_seq.astype(w_out.dtype), w_out,
                   preferred_element_type=jnp.float32)
        + b_out
    )

    new_state = (h_fin[:, :fast_dim], h_fin[:, fast_dim:ctx],
                 u_fin[:, :fast_dim], u_fin[:, fast_dim:ctx])
    return y, new_state


# ---------------------------------------------------------------------------
# Public API
# ---------------------------------------------------------------------------
def pack_params(params, *, weight_dtype=jnp.bfloat16):
    """Pack PyTorch-style (in_features, out_features) weights for the kernel."""
    in_dim, fast_dim = params["w_i2f"].shape
    slow_dim = params["w_s2s"].shape[0]
    out_dim = params["w_out"].shape[1]
    ctx = fast_dim + slow_dim
    ctx_pad = _round_up(ctx, 128)

    # input -> [fast | slow | pad]  (x only feeds the fast context)
    w_x = jnp.zeros((in_dim, ctx_pad), jnp.float32)
    w_x = w_x.at[:, :fast_dim].set(params["w_i2f"]).astype(weight_dtype)

    # [h_fast | h_slow | pad] -> [fast | slow | pad] block matrix
    w_h = jnp.zeros((ctx_pad, ctx_pad), jnp.float32)
    w_h = w_h.at[:fast_dim, :fast_dim].set(params["w_f2f"])
    w_h = w_h.at[:fast_dim, fast_dim:ctx].set(params["w_f2s"])
    w_h = w_h.at[fast_dim:ctx, :fast_dim].set(params["w_s2f"])
    w_h = w_h.at[fast_dim:ctx, fast_dim:ctx].set(params["w_s2s"])
    w_h = w_h.astype(weight_dtype)

    return {
        "w_x": w_x,
        "w_h": w_h,
        "w_out": params["w_out"].astype(weight_dtype),
        "b_out": params["b_out"].astype(jnp.float32),
        "dims": (in_dim, fast_dim, slow_dim, out_dim),
    }


def basic_mtrnn_sequence(x_seq, state, packed, *, fast_tau, slow_tau):
    """Run the BasicMTRNN cell over a sequence x_seq: (T, B, in_dim)."""
    _, B, _ = x_seq.shape
    _, fast_dim, slow_dim, _ = packed["dims"]
    if state is None:
        h_fast = jnp.zeros((B, fast_dim), jnp.float32)
        h_slow = jnp.zeros((B, slow_dim), jnp.float32)
        u_fast = jnp.zeros((B, fast_dim), jnp.float32)
        u_slow = jnp.zeros((B, slow_dim), jnp.float32)
    else:
        h_fast, h_slow, u_fast, u_slow = state
    return _mtrnn_sequence_impl(
        x_seq, h_fast, h_slow, u_fast, u_slow,
        packed["w_x"], packed["w_h"], packed["w_out"], packed["b_out"],
        fast_tau=float(fast_tau), slow_tau=float(slow_tau))


def basic_mtrnn_forward(x, state, packed, *, fast_tau, slow_tau):
    """Single step matching BasicMTRNN.forward: x (B, in_dim) -> (y, state)."""
    y_seq, new_state = basic_mtrnn_sequence(
        x[None], state, packed, fast_tau=fast_tau, slow_tau=slow_tau)
    return y_seq[0], new_state


# ---------------------------------------------------------------------------
# Pure-JAX references (mirror the PyTorch module)
# ---------------------------------------------------------------------------
def _reference_forward(x, state, params, *, fast_tau, slow_tau):
    B = x.shape[0]
    fast_dim = params["w_i2f"].shape[1]
    slow_dim = params["w_s2s"].shape[0]
    if state is None:
        h_fast = jnp.zeros((B, fast_dim), jnp.float32)
        h_slow = jnp.zeros((B, slow_dim), jnp.float32)
        u_fast = jnp.zeros((B, fast_dim), jnp.float32)
        u_slow = jnp.zeros((B, slow_dim), jnp.float32)
    else:
        h_fast, h_slow, u_fast, u_slow = state
    new_u_fast = (1.0 - 1.0 / fast_tau) * u_fast + (1.0 / fast_tau) * (
        x @ params["w_i2f"] + h_fast @ params["w_f2f"] + h_slow @ params["w_s2f"])
    new_u_slow = (1.0 - 1.0 / slow_tau) * u_slow + (1.0 / slow_tau) * (
        h_fast @ params["w_f2s"] + h_slow @ params["w_s2s"])
    new_h_fast = jnp.tanh(new_u_fast)
    new_h_slow = jnp.tanh(new_u_slow)
    y = jnp.tanh(new_h_fast @ params["w_out"] + params["b_out"][None, :])
    return y, (new_h_fast, new_h_slow, new_u_fast, new_u_slow)


def _reference_sequence(x_seq, state, params, *, fast_tau, slow_tau):
    B = x_seq.shape[1]
    fast_dim = params["w_i2f"].shape[1]
    slow_dim = params["w_s2s"].shape[0]
    if state is None:
        state = (jnp.zeros((B, fast_dim), jnp.float32),
                 jnp.zeros((B, slow_dim), jnp.float32),
                 jnp.zeros((B, fast_dim), jnp.float32),
                 jnp.zeros((B, slow_dim), jnp.float32))

    def step(carry, xt):
        y, new_state = _reference_forward(
            xt, carry, params, fast_tau=fast_tau, slow_tau=slow_tau)
        return new_state, y

    final_state, ys = jax.lax.scan(step, state, x_seq)
    return ys, final_state


def init_params(key, in_dim, fast_dim, slow_dim, out_dim):
    """Deterministic synthetic parameters, (in_features, out_features) layout."""
    ks = jax.random.split(key, 7)

    def lin(k, fan_in, fan_out):
        bound = 1.0 / jnp.sqrt(jnp.float32(fan_in))
        return jax.random.uniform(k, (fan_in, fan_out), jnp.float32, -bound, bound)

    return {
        "w_i2f": lin(ks[0], in_dim, fast_dim),
        "w_f2f": lin(ks[1], fast_dim, fast_dim),
        "w_f2s": lin(ks[2], fast_dim, slow_dim),
        "w_s2s": lin(ks[3], slow_dim, slow_dim),
        "w_s2f": lin(ks[4], slow_dim, fast_dim),
        "w_out": lin(ks[5], fast_dim, out_dim),
        "b_out": jax.random.uniform(
            ks[6], (out_dim,), jnp.float32,
            -1.0 / jnp.sqrt(jnp.float32(fast_dim)),
            1.0 / jnp.sqrt(jnp.float32(fast_dim))),
    }


if __name__ == "__main__":
    # Small shapes consistent with BasicMTRNN; B=8 fills one sublane.
    B, T = 8, 8
    in_dim, fast_dim, slow_dim = 4, 32, 16
    out_dim = in_dim                 # BasicMTRNN default: out_dim = in_dim
    fast_tau, slow_tau = 2.0, 12.0

    key = jax.random.PRNGKey(0)
    kx, kxs, kh, kp, kxl = jax.random.split(key, 5)

    params = init_params(kp, in_dim, fast_dim, slow_dim, out_dim)
    packed_f32 = pack_params(params, weight_dtype=jnp.float32)

    # --- 1. single step (the module's forward), non-zero previous state -----
    x = jax.random.normal(kx, (B, in_dim), jnp.float32)
    khf, khs, kuf, kus = jax.random.split(kh, 4)
    state = (jax.random.normal(khf, (B, fast_dim), jnp.float32),
             jax.random.normal(khs, (B, slow_dim), jnp.float32),
             jax.random.normal(kuf, (B, fast_dim), jnp.float32),
             jax.random.normal(kus, (B, slow_dim), jnp.float32))

    y, new_state = basic_mtrnn_forward(
        x, state, packed_f32, fast_tau=fast_tau, slow_tau=slow_tau)
    jax.block_until_ready((y, new_state))

    y_ref, state_ref = _reference_forward(
        x, state, params, fast_tau=fast_tau, slow_tau=slow_tau)
    assert jnp.allclose(y, y_ref, atol=1e-5, rtol=1e-5)
    for a, b in zip(new_state, state_ref):
        assert jnp.allclose(a, b, atol=1e-5, rtol=1e-5)

    # --- 2. fused sequence (time loop inside the kernel), zero init state ---
    x_seq = jax.random.normal(kxs, (T, B, in_dim), jnp.float32)
    y_seq, final_state = basic_mtrnn_sequence(
        x_seq, None, packed_f32, fast_tau=fast_tau, slow_tau=slow_tau)
    jax.block_until_ready((y_seq, final_state))

    y_seq_ref, final_ref = _reference_sequence(
        x_seq, None, params, fast_tau=fast_tau, slow_tau=slow_tau)
    assert jnp.allclose(y_seq, y_seq_ref, atol=1e-4, rtol=1e-4)
    for a, b in zip(final_state, final_ref):
        assert jnp.allclose(a, b, atol=1e-4, rtol=1e-4)

    # --- 3. longer sequence exercising time-blocking + tail padding ---------
    T_long = 40                       # ts=32, 2 blocks, last block padded
    x_long = jax.random.normal(kxl, (T_long, B, in_dim), jnp.float32)
    y_long, final_long = basic_mtrnn_sequence(
        x_long, None, packed_f32, fast_tau=fast_tau, slow_tau=slow_tau)
    jax.block_until_ready((y_long, final_long))
    y_long_ref, final_long_ref = _reference_sequence(
        x_long, None, params, fast_tau=fast_tau, slow_tau=slow_tau)
    assert jnp.allclose(y_long, y_long_ref, atol=1e-4, rtol=1e-4)
    for a, b in zip(final_long, final_long_ref):
        assert jnp.allclose(a, b, atol=1e-4, rtol=1e-4)

    # --- 4. default bf16 weights (MXU-native); f32 accumulation & elemwise --
    packed_bf16 = pack_params(params)          # weight_dtype defaults to bf16
    y_bf16, _ = basic_mtrnn_sequence(
        x_seq, None, packed_bf16, fast_tau=fast_tau, slow_tau=slow_tau)
    jax.block_until_ready(y_bf16)
    assert jnp.allclose(y_bf16, y_seq_ref, atol=5e-2, rtol=5e-2)

    print("KERNEL_OK")
</pallas_src>

<mosaic_0001>
module attributes {stable_mosaic.version = 11 : i64} {
  func.func @_mtrnn_time_block_kernel(%arg0: i32, %arg1: memref<1x8x128xf32, #tpu.memory_space<vmem>>, %arg2: memref<8x128xf32, #tpu.memory_space<vmem>>, %arg3: memref<8x128xf32, #tpu.memory_space<vmem>>, %arg4: memref<8x128xf32, #tpu.memory_space<vmem>>, %arg5: memref<8x128xf32, #tpu.memory_space<vmem>>, %arg6: memref<128x128xf32, #tpu.memory_space<vmem>>, %arg7: memref<1x8x128xf32, #tpu.memory_space<vmem>>, %arg8: memref<8x128xf32, #tpu.memory_space<vmem>>, %arg9: memref<8x128xf32, #tpu.memory_space<vmem>>, %arg10: memref<8x128xf32, #tpu.memory_space<vmem>>, %arg11: memref<8x128xf32, #tpu.memory_space<vmem>>) attributes {dimension_semantics = [#tpu.dimension_semantics<arbitrary>], iteration_bounds = array<i64: 1>, scalar_prefetch = 0 : i64, scratch_operands = 2 : i64, tpu.core_type = #tpu.core_type<tc>, window_params = [{transform_indices = @transform_0, window_bounds = array<i64: 1, 8, 128>}, {pipeline_mode = #tpu.pipeline_mode<synchronous>, transform_indices = @transform_1, window_bounds = array<i64: 8, 128>}, {pipeline_mode = #tpu.pipeline_mode<synchronous>, transform_indices = @transform_2, window_bounds = array<i64: 8, 128>}, {pipeline_mode = #tpu.pipeline_mode<synchronous>, transform_indices = @transform_3, window_bounds = array<i64: 8, 128>}, {pipeline_mode = #tpu.pipeline_mode<synchronous>, transform_indices = @transform_4, window_bounds = array<i64: 8, 128>}, {pipeline_mode = #tpu.pipeline_mode<synchronous>, transform_indices = @transform_5, window_bounds = array<i64: 128, 128>}, {transform_indices = @transform_6, window_bounds = array<i64: 1, 8, 128>}, {pipeline_mode = #tpu.pipeline_mode<synchronous>, transform_indices = @transform_7, window_bounds = array<i64: 8, 128>}, {pipeline_mode = #tpu.pipeline_mode<synchronous>, transform_indices = @transform_8, window_bounds = array<i64: 8, 128>}]} {
    %c0_i32 = arith.constant 0 : i32
    %0 = arith.cmpi eq, %arg0, %c0_i32 : i32
    %1 = arith.extui %0 : i1 to i32
    %c0_i32_0 = arith.constant 0 : i32
    %2 = arith.cmpi ne, %1, %c0_i32_0 : i32
    scf.if %2 {
      %c0_22 = arith.constant 0 : index
      %c0_23 = arith.constant 0 : index
      %28 = vector.load %arg2[%c0_22, %c0_23] : memref<8x128xf32, #tpu.memory_space<vmem>>, vector<8x128xf32>
      %c0_24 = arith.constant 0 : index
      %c0_25 = arith.constant 0 : index
      %29 = vector.load %arg10[%c0_24, %c0_25] : memref<8x128xf32, #tpu.memory_space<vmem>>, vector<8x128xf32>
      tpu.vector_store %arg10[%c0_24, %c0_25], %28 {strides = array<i32>} : memref<8x128xf32, #tpu.memory_space<vmem>>, vector<8x128xf32>,
      %c0_26 = arith.constant 0 : index
      %c0_27 = arith.constant 0 : index
      %30 = vector.load %arg3[%c0_26, %c0_27] : memref<8x128xf32, #tpu.memory_space<vmem>>, vector<8x128xf32>
      %c0_28 = arith.constant 0 : index
      %c0_29 = arith.constant 0 : index
      %31 = vector.load %arg11[%c0_28, %c0_29] : memref<8x128xf32, #tpu.memory_space<vmem>>, vector<8x128xf32>
      tpu.vector_store %arg11[%c0_28, %c0_29], %30 {strides = array<i32>} : memref<8x128xf32, #tpu.memory_space<vmem>>, vector<8x128xf32>,
      %c0_30 = arith.constant 0 : index
      %c0_31 = arith.constant 0 : index
      %32 = vector.load %arg2[%c0_30, %c0_31] : memref<8x128xf32, #tpu.memory_space<vmem>>, vector<8x128xf32>
      %c0_32 = arith.constant 0 : index
      %c0_33 = arith.constant 0 : index
      %33 = vector.load %arg8[%c0_32, %c0_33] : memref<8x128xf32, #tpu.memory_space<vmem>>, vector<8x128xf32>
      tpu.vector_store %arg8[%c0_32, %c0_33], %32 {strides = array<i32>} : memref<8x128xf32, #tpu.memory_space<vmem>>, vector<8x128xf32>,
      %c0_34 = arith.constant 0 : index
      %c0_35 = arith.constant 0 : index
      %34 = vector.load %arg3[%c0_34, %c0_35] : memref<8x128xf32, #tpu.memory_space<vmem>>, vector<8x128xf32>
      %c0_36 = arith.constant 0 : index
      %c0_37 = arith.constant 0 : index
      %35 = vector.load %arg9[%c0_36, %c0_37] : memref<8x128xf32, #tpu.memory_space<vmem>>, vector<8x128xf32>
      tpu.vector_store %arg9[%c0_36, %c0_37], %34 {strides = array<i32>} : memref<8x128xf32, #tpu.memory_space<vmem>>, vector<8x128xf32>,
    } else {
    }
    %c0 = arith.constant 0 : index
    %c0_1 = arith.constant 0 : index
    %3 = vector.load %arg6[%c0, %c0_1] : memref<128x128xf32, #tpu.memory_space<vmem>>, vector<128x128xf32>
    %c0_2 = arith.constant 0 : index
    %c0_3 = arith.constant 0 : index
    %4 = vector.load %arg4[%c0_2, %c0_3] : memref<8x128xf32, #tpu.memory_space<vmem>>, vector<8x128xf32>
    %c0_4 = arith.constant 0 : index
    %c0_5 = arith.constant 0 : index
    %5 = vector.load %arg5[%c0_4, %c0_5] : memref<8x128xf32, #tpu.memory_space<vmem>>, vector<8x128xf32>
    %c1_i32 = arith.constant 1 : i32
    %6 = arith.muli %arg0, %c1_i32 : i32
    %c0_6 = arith.constant 0 : index
    %c0_7 = arith.constant 0 : index
    %7 = vector.load %arg10[%c0_6, %c0_7] : memref<8x128xf32, #tpu.memory_space<vmem>>, vector<8x128xf32>
    %c0_8 = arith.constant 0 : index
    %c0_9 = arith.constant 0 : index
    %8 = vector.load %arg11[%c0_8, %c0_9] : memref<8x128xf32, #tpu.memory_space<vmem>>, vector<8x128xf32>
    %c0_i32_10 = arith.constant 0 : i32
    %9 = arith.index_cast %c0_i32_10 : i32 to index
    %c0_11 = arith.constant 0 : index
    %c0_12 = arith.constant 0 : index
    %10 = vector.load %arg1[%9, %c0_11, %c0_12] : memref<1x8x128xf32, #tpu.memory_space<vmem>>, vector<1x8x128xf32>
    %11 = vector.shape_cast %10 : vector<1x8x128xf32> to vector<8x128xf32>
    %cst = arith.constant dense<0.000000e+00> : vector<8x128xf32>
    %12 = tpu.matmul %7, %3, %cst {dimension_numbers = #tpu.dot_dimension_numbers<[1], [0], [0], [1], [0, 0, 1, 1], [], []>} : vector<8x128xf32>, vector<128x128xf32>, vector<8x128xf32> -> vector<8x128xf32>
    %13 = arith.addf %11, %12 : vector<8x128xf32>
    %14 = arith.mulf %4, %8 : vector<8x128xf32>
    %15 = arith.mulf %5, %13 : vector<8x128xf32>
    %16 = arith.addf %14, %15 : vector<8x128xf32>
    %17 = math.tanh %16 : vector<8x128xf32>
    %18 = arith.index_cast %c0_i32_10 : i32 to index
    %c0_13 = arith.constant 0 : index
    %c0_14 = arith.constant 0 : index
    %19 = vector.load %arg7[%18, %c0_13, %c0_14] : memref<1x8x128xf32, #tpu.memory_space<vmem>>, vector<1x8x128xf32>
    %20 = vector.shape_cast %19 : vector<1x8x128xf32> to vector<8x128xf32>
    %21 = vector.shape_cast %17 : vector<8x128xf32> to vector<1x8x128xf32>
    tpu.vector_store %arg7[%18, %c0_13, %c0_14], %21 {strides = array<i32>} : memref<1x8x128xf32, #tpu.memory_space<vmem>>, vector<1x8x128xf32>,
    %22 = arith.addi %6, %c0_i32_10 : i32
    %c0_i32_15 = arith.constant 0 : i32
    %23 = arith.cmpi eq, %22, %c0_i32_15 : i32
    %24 = arith.extui %23 : i1 to i32
    %c0_i32_16 = arith.constant 0 : i32
    %25 = arith.cmpi ne, %24, %c0_i32_16 : i32
    scf.if %25 {
      %c0_22 = arith.constant 0 : index
      %c0_23 = arith.constant 0 : index
      %28 = vector.load %arg8[%c0_22, %c0_23] : memref<8x128xf32, #tpu.memory_space<vmem>>, vector<8x128xf32>
      tpu.vector_store %arg8[%c0_22, %c0_23], %17 {strides = array<i32>} : memref<8x128xf32, #tpu.memory_space<vmem>>, vector<8x128xf32>,
      %c0_24 = arith.constant 0 : index
      %c0_25 = arith.constant 0 : index
      %29 = vector.load %arg9[%c0_24, %c0_25] : memref<8x128xf32, #tpu.memory_space<vmem>>, vector<8x128xf32>
      tpu.vector_store %arg9[%c0_24, %c0_25], %16 {strides = array<i32>} : memref<8x128xf32, #tpu.memory_space<vmem>>, vector<8x128xf32>,
    } else {
    }
    %c1_i32_17 = arith.constant 1 : i32
    %c0_18 = arith.constant 0 : index
    %c0_19 = arith.constant 0 : index
    %26 = vector.load %arg10[%c0_18, %c0_19] : memref<8x128xf32, #tpu.memory_space<vmem>>, vector<8x128xf32>
    tpu.vector_store %arg10[%c0_18, %c0_19], %17 {strides = array<i32>} : memref<8x128xf32, #tpu.memory_space<vmem>>, vector<8x128xf32>,
    %c0_20 = arith.constant 0 : index
    %c0_21 = arith.constant 0 : index
    %27 = vector.load %arg11[%c0_20, %c0_21] : memref<8x128xf32, #tpu.memory_space<vmem>>, vector<8x128xf32>
    tpu.vector_store %arg11[%c0_20, %c0_21], %16 {strides = array<i32>} : memref<8x128xf32, #tpu.memory_space<vmem>>, vector<8x128xf32>,
    return
  }
  func.func @transform_0(%arg0: i32) -> (i32, i32, i32) {
    %c0_i32 = arith.constant 0 : i32
    %c0_i32_0 = arith.constant 0 : i32
    %c0_i32_1 = arith.constant 0 : i32
    return %arg0, %c0_i32, %c0_i32_0 : i32, i32, i32
  }
  func.func @transform_1(%arg0: i32) -> (i32, i32) {
    %c0_i32 = arith.constant 0 : i32
    %c0_i32_0 = arith.constant 0 : i32
    %c0_i32_1 = arith.constant 0 : i32
    return %c0_i32, %c0_i32_0 : i32, i32
  }
  func.func @transform_2(%arg0: i32) -> (i32, i32) {
    %c0_i32 = arith.constant 0 : i32
    %c0_i32_0 = arith.constant 0 : i32
    %c0_i32_1 = arith.constant 0 : i32
    return %c0_i32, %c0_i32_0 : i32, i32
  }
  func.func @transform_3(%arg0: i32) -> (i32, i32) {
    %c0_i32 = arith.constant 0 : i32
    %c0_i32_0 = arith.constant 0 : i32
    %c0_i32_1 = arith.constant 0 : i32
    return %c0_i32, %c0_i32_0 : i32, i32
  }
  func.func @transform_4(%arg0: i32) -> (i32, i32) {
    %c0_i32 = arith.constant 0 : i32
    %c0_i32_0 = arith.constant 0 : i32
    %c0_i32_1 = arith.constant 0 : i32
    return %c0_i32, %c0_i32_0 : i32, i32
  }
  func.func @transform_5(%arg0: i32) -> (i32, i32) {
    %c0_i32 = arith.constant 0 : i32
    %c0_i32_0 = arith.constant 0 : i32
    %c0_i32_1 = arith.constant 0 : i32
    return %c0_i32, %c0_i32_0 : i32, i32
  }
  func.func @transform_6(%arg0: i32) -> (i32, i32, i32) {
    %c0_i32 = arith.constant 0 : i32
    %c0_i32_0 = arith.constant 0 : i32
    %c0_i32_1 = arith.constant 0 : i32
    return %arg0, %c0_i32, %c0_i32_0 : i32, i32, i32
  }
  func.func @transform_7(%arg0: i32) -> (i32, i32) {
    %c0_i32 = arith.constant 0 : i32
    %c0_i32_0 = arith.constant 0 : i32
    %c0_i32_1 = arith.constant 0 : i32
    return %c0_i32, %c0_i32_0 : i32, i32
  }
  func.func @transform_8(%arg0: i32) -> (i32, i32) {
    %c0_i32 = arith.constant 0 : i32
    %c0_i32_0 = arith.constant 0 : i32
    %c0_i32_1 = arith.constant 0 : i32
    return %c0_i32, %c0_i32_0 : i32, i32
  }
}

</mosaic_0001>

<bundles_post_ra>
// kernel: _mtrnn_sequence_impl.1
= control target key start
LH: loop header
LB: loop body
LE: loop exit
PB: predicated region body
PF: predicated region fallthrough
CT: control target
= control target key end

     0   :  { %14 = vsyncpa [#allocation5], 0  ;;  %s277_s27 = smov [#allocation4]   ;;  %s364_s0 = inlined_call_operand.vmem [shape: f32[1,8,128], index: 0, kind: input, shape index: {}]   ;;  %s365_s1 = inlined_call_operand.vmem [shape: f32[8,128], index: 1, kind: input, shape index: {}, may-alias: {1,7}]   ;;  %s366_s2 = inlined_call_operand.vmem [shape: f32[8,128], index: 2, kind: input, shape index: {}, may-alias: {2,8}]   ;;  %s367_s3 = inlined_call_operand.vmem [shape: f32[8,128], index: 3, kind: input, shape index: {}]   ;;  %s368_s4 = inlined_call_operand.vmem [shape: f32[8,128], index: 4, kind: input, shape index: {}]   ;;  %s369_s5 = inlined_call_operand.hbm [shape: f32[128,128], index: 5, kind: input, shape index: {}]   ;;  %s370_s6 = inlined_call_operand.vmem [shape: f32[1,8,128], index: 6, kind: output, shape index: {0}]   ;;  %s371_s7 = inlined_call_operand.vmem [shape: f32[8,128], index: 7, kind: output, shape index: {1}, may-alias: {1,7}]   ;;  %s372_s8 = inlined_call_operand.vmem [shape: f32[8,128], index: 8, kind: output, shape index: {2}, may-alias: {2,8}]  }
   0x1   :  { %s30_s28 = sshll.u32 %s277_s27, 4  ;;  %s253_s9 = scalar_lea.hbm %s369_s5, 2048  ;;  %s31_s28 = int_to_ptr.vmem [resolvable:$true] %s30_s28 }
   0x2   :  { %p254_p0 = scmp.ne.s32.totalorder %s369_s5, %s253_s9  ;;  %p257_p1 = scmp.lt.u32.totalorder %s253_s9, %s369_s5 }
   0x4   :  { %p259_p2 = pnand %p257_p1, %p254_p0 }
   0x6   :  { %262 = shalt.err (!%p259_p2)
}
   0x7   :  { %s263_s14 = scalar_lea.vmem %s31_s28, 2048  ;;  %p268_p4 = scmp.lt.s32.totalorder %s31_s28, %s31_s28 }
   0x8   :  { %p264_p3 = scmp.ne.s32.totalorder %s31_s28, %s263_s14  ;;  %p269_p5 = scmp.lt.s32.totalorder %s263_s14, %s263_s14 }
   0xa   :  { %p270_p6 = por %p269_p5, %p268_p4 }
   0xc   :  { %p271_p7 = pnand %p270_p6, %p264_p3 }
   0xe   :  { %274 = shalt.err (!%p271_p7)
}
   0xf   :  { %s278_s15 = smov 128   ;;  %s279_s16 = smov 8  }
  0x10   :  { %36 = dma.hbm_to_vmem [thread:$0]  %s369_s5, 2048, %s31_s28, [#allocation5], %s278_s15, %s278_s15, %s279_s16  }
  0x11   :  { %275 = dma.done.wait [#allocation5], 2048  }
  0x12   :  { %276 = vsyncadd [#allocation5], 4294965248  ;;  %v280_v0 = vmov 0.0|0.0   ;;  %vm281_vm0 = vmmov 0   ;;  %v282_v1 = vmov 0.0   ;;  %v52_v2 = vld [vmem:[#allocation4] sm:$0xff] }
  0x13   :  { %221 = vmatprep.subr.bf16.mxu0 %v280_v0  ;;  %218 = vmatprep.mubr.msk.f32.mxu0 %vm281_vm0, %v282_v1  ;;  %v53_v3 = vld [vmem:[#allocation4 + $0x8] sm:$0xff]  ;;  %v54_v4 = vld [vmem:[#allocation4 + $0x10] sm:$0xff]  ;;  %v55_v6 = vld [vmem:[#allocation4 + $0x18] sm:$0xff] }
  0x14   :  { %v222_v5 = vpack.c.bf16 %v53_v3, %v52_v2  ;;  %v225_v7 = vpack.c.bf16 %v55_v6, %v54_v4  ;;  %v56_v8 = vld [vmem:[#allocation4 + $0x20] sm:$0xff]  ;;  %v57_v9 = vld [vmem:[#allocation4 + $0x28] sm:$0xff]  ;;  %v58_v11 = vld [vmem:[#allocation4 + $0x30] sm:$0xff] }
  0x15   :  { %v228_v10 = vpack.c.bf16 %v57_v9, %v56_v8  ;;  %v59_v12 = vld [vmem:[#allocation4 + $0x38] sm:$0xff]  ;;  %v60_v14 = vld [vmem:[#allocation4 + $0x40] sm:$0xff]  ;;  %v61_v15 = vld [vmem:[#allocation4 + $0x48] sm:$0xff] }
  0x16   :  { %223 = vmatpush3.bf16.msra.mxu0 %v222_v5  ;;  %v231_v13 = vpack.c.bf16 %v59_v12, %v58_v11  ;;  %v234_v16 = vpack.c.bf16 %v61_v15, %v60_v14  ;;  %v62_v17 = vld [vmem:[#allocation4 + $0x50] sm:$0xff]  ;;  %v63_v18 = vld [vmem:[#allocation4 + $0x58] sm:$0xff]  ;;  %v64_v20 = vld [vmem:[#allocation4 + $0x60] sm:$0xff] }
  0x17   :  { %224 = vmatprep.subr.bf16.mxu0 %v280_v0  ;;  %v237_v19 = vpack.c.bf16 %v63_v18, %v62_v17  ;;  %v65_v21 = vld [vmem:[#allocation4 + $0x68] sm:$0xff]  ;;  %v66_v23 = vld [vmem:[#allocation4 + $0x70] sm:$0xff]  ;;  %v67_v24 = vld [vmem:[#allocation4 + $0x78] sm:$0xff] }
  0x18   :  { %v240_v22 = vpack.c.bf16 %v65_v21, %v64_v20  ;;  %v243_v25 = vpack.c.bf16 %v67_v24, %v66_v23  ;;  %v44_v26 = vld [vmem:[%s365_s1] sm:$0xff] }
  0x19   :  { %v46_v27 = vld [vmem:[%s366_s2] sm:$0xff] }
  0x1a   :  { %226 = vmatpush3.bf16.msra.mxu0 %v225_v7  ;;  %v68_v28 = vld [vmem:[%s367_s3] sm:$0xff] }
  0x1b   :  { %227 = vmatprep.subr.bf16.mxu0 %v280_v0  ;;  %v72_v29 = vld [vmem:[%s364_s0] sm:$0xff]  ;;  %v144_v33 = vmul.f32 %v68_v28, %v46_v27 }
  0x1c   :  { %v69_v30 = vld [vmem:[%s368_s4] sm:$0xff] }
  0x1e   :  { %229 = vmatpush3.bf16.msra.mxu0 %v228_v10 }
  0x1f   :  { %230 = vmatprep.subr.bf16.mxu0 %v280_v0 }
  0x22   :  { %232 = vmatpush3.bf16.msra.mxu0 %v231_v13 }
  0x23   :  { %233 = vmatprep.subr.bf16.mxu0 %v280_v0 }
  0x26   :  { %235 = vmatpush3.bf16.msra.mxu0 %v234_v16 }
  0x27   :  { %236 = vmatprep.subr.bf16.mxu0 %v280_v0 }
  0x2a   :  { %238 = vmatpush3.bf16.msra.mxu0 %v237_v19 }
  0x2b   :  { %239 = vmatprep.subr.bf16.mxu0 %v280_v0 }
  0x2e   :  { %241 = vmatpush3.bf16.msra.mxu0 %v240_v22 }
  0x2f   :  { %242 = vmatprep.subr.bf16.mxu0 %v280_v0 }
  0x32   :  { %244 = vmatpush3.bf16.msra.mxu0 %v243_v25 }
  0x35   :  { %219 = vmatmul.mubr.f32.vlgmr.msra.gmra.mrb[0].mxu0 %v44_v26 }
 0x108   :  { %v139_v31 = vpop.f32.mrb[0].mxu0 }
 0x109   :  { %v143_v32 = vadd.f32 %v139_v31, %v72_v29  ;;  %v220_v34 = vpop.f32.mrb[1].mxu0 }
 0x10b   :  { %v145_v35 = vmul.f32 %v143_v32, %v69_v30 }
 0x10d   :  { %v146_v36 = vadd.f32 %v145_v35, %v144_v33 }
 0x10f   :  { %251 = vtanh.f32 %v146_v36  ;;  %153 = vst [vmem:[%s372_s8] sm:$0xff] %v146_v36 }
 0x119   :  { %v252_v37 = vpop.eup %251 }
 0x11a   :  { %148 = vst [vmem:[%s370_s6] sm:$0xff] %v252_v37  ;;  %152 = vst [vmem:[%s371_s7] sm:$0xff] %v252_v37 }
 0x11b   :  { %168 = vsyncpa [#allocation5], 1 }

</bundles_post_ra>
